<compile_context>
chip_gen: v6e
topology: v6e:2x2x1
jax: 0.10.0
libtpu: 0.0.40
codegen_flags: <defaults>
</compile_context>

<pallas_src>
import math

import jax
import jax.numpy as jnp
from jax import lax
from jax.experimental import pallas as pl
from jax.experimental.pallas import tpu as pltpu

K = 10           # Bern_prop(10)
HIDDEN = 128     # Linear(num_features, 128)
NUM_CLASSES = 5  # Linear(128, 5)
C_PAD = 128      # lane-dense padded class dimension


def bernnet_kernel(coef_ref,            # SMEM (K+1,) f32 : comb(K,k)/2^K * relu(temp[k])
                   x_ref,               # VMEM (N, F)        bf16
                   w1_ref, b1_ref,      # VMEM (F, 128) bf16, (1, 128) f32
                   w2_ref, b2_ref,      # VMEM (128, C_PAD) bf16, (1, C_PAD) f32
                   L_ref,               # VMEM (N, N)        bf16
                   logits_ref,          # VMEM (N, C_PAD) f32  out
                   pred_ref,            # VMEM (N, 1) int32    out
                   tmp_ref):            # VMEM scratch (K+1, N, C_PAD) f32
    mm_dtype = L_ref.dtype

    # ---- MLP hot path (dropout is identity in eval mode) ----
    h = jnp.dot(x_ref[...], w1_ref[...], preferred_element_type=jnp.float32) + b1_ref[...]
    h = jnp.maximum(h, 0.0)
    z = jnp.dot(h.astype(mm_dtype), w2_ref[...],
                preferred_element_type=jnp.float32) + b2_ref[...]

    L = L_ref[...]

    # ---- Phase 1: tmp[i] = (2I - L)^i z, computed as 2*y - L@y (M2 never materialized) ----
    tmp_ref[0] = z

    def power_step(i, carry):
        prev = tmp_ref[i - 1]
        tmp_ref[i] = 2.0 * prev - jnp.dot(L, prev.astype(mm_dtype),
                                          preferred_element_type=jnp.float32)
        return carry

    lax.fori_loop(1, K + 1, power_step, 0)

    # ---- Phase 2: Horner in L ----
    #   out = c_0 tmp[K] + L(c_1 tmp[K-1] + L(c_2 tmp[K-2] + ... + L(c_K tmp[0]) ... ))
    # i.e. acc = c_K*tmp[0]; for k = K-1 .. 0: acc = L@acc + c_k*tmp[K-k]
    acc0 = coef_ref[K] * tmp_ref[0]

    def horner_step(j, acc):
        k = K - 1 - j
        return (jnp.dot(L, acc.astype(mm_dtype), preferred_element_type=jnp.float32)
                + coef_ref[k] * tmp_ref[j + 1])

    out = lax.fori_loop(0, K, horner_step, acc0)

    # ---- masked log_softmax over the real (first NUM_CLASSES) columns ----
    col = lax.broadcasted_iota(jnp.int32, out.shape, 1)
    valid = col < NUM_CLASSES
    neg_inf = jnp.float32(-jnp.inf)
    out_m = jnp.where(valid, out, neg_inf)
    m = jnp.max(out_m, axis=1, keepdims=True)
    p = jnp.where(valid, jnp.exp(out - m), 0.0)
    lse = m + jnp.log(jnp.sum(p, axis=1, keepdims=True))
    logits = jnp.where(valid, out - lse, neg_inf)
    logits_ref[...] = logits

    # ---- argmax over classes (first occurrence on ties); padded cols are -inf, never win ----
    row_max = jnp.max(logits, axis=1, keepdims=True)
    is_max = logits == row_max
    pred = jnp.min(jnp.where(is_max, col, C_PAD), axis=1, keepdims=True)
    pred_ref[...] = pred.astype(jnp.int32)


def bernnet_forward(x, edge_index, params, *, matmul_dtype=jnp.bfloat16):
    """x: (N, F) float32 node features; edge_index: (2, E) int32 (directed edge list)."""
    N, F_dim = x.shape
    w1, b1, w2, b2, temp = params  # w1:(128,F), b1:(128,), w2:(5,128), b2:(5,), temp:(K+1,)

    # --- glue: dense sym-normalized Laplacian L = I - D^{-1/2} A D^{-1/2} (M2 = 2I - L is implicit) ---
    src, dst = edge_index[0], edge_index[1]
    A = jnp.zeros((N, N), jnp.float32).at[src, dst].add(1.0)
    deg = jnp.sum(A, axis=1)
    dinv = jnp.where(deg > 0.0, lax.rsqrt(jnp.where(deg > 0.0, deg, 1.0)), 0.0)
    L = (jnp.eye(N, dtype=jnp.float32) - dinv[:, None] * A * dinv[None, :]).astype(matmul_dtype)

    # --- glue: Bernstein coefficients comb(K,k)/2^K * relu(temp[k]) ---
    binom = jnp.array([math.comb(K, k) / (2.0 ** K) for k in range(K + 1)], jnp.float32)
    coef = binom * jax.nn.relu(temp)

    # torch Linear computes x @ W^T + b -> pass transposed weights (bf16), row-vector biases (f32).
    x_in = x.astype(matmul_dtype)
    w1_t = jnp.transpose(w1).astype(matmul_dtype)                       # (F, 128)
    b1_r = b1.reshape(1, HIDDEN).astype(jnp.float32)                    # (1, 128)
    w2_t = jnp.zeros((HIDDEN, C_PAD), matmul_dtype).at[:, :NUM_CLASSES].set(
        jnp.transpose(w2).astype(matmul_dtype))                         # (128, C_PAD) zero-padded
    b2_r = jnp.zeros((1, C_PAD), jnp.float32).at[0, :NUM_CLASSES].set(
        b2.astype(jnp.float32))                                         # (1, C_PAD) zero-padded

    vmem = pl.BlockSpec(memory_space=pltpu.MemorySpace.VMEM)
    smem = pl.BlockSpec(memory_space=pltpu.MemorySpace.SMEM)

    itemsize = jnp.dtype(matmul_dtype).itemsize
    in_bytes = (coef.size * 4 + x_in.size * itemsize + w1_t.size * itemsize
                + b1_r.size * 4 + w2_t.size * itemsize + b2_r.size * 4
                + L.size * itemsize)
    out_bytes = N * C_PAD * 4 + N * 4
    scratch_bytes = (K + 1) * N * C_PAD * 4
    # Generous, explicit scoped-VMEM budget (clamped below v7x's 64 MiB physical).
    vmem_limit = int(min(60 * 2 ** 20,
                         max(16 * 2 ** 20,
                             2 * (in_bytes + out_bytes) + scratch_bytes + 8 * N * C_PAD * 4)))

    flops = (2.0 * N * F_dim * HIDDEN          # x @ W1
             + 2.0 * N * HIDDEN * C_PAD        # h @ W2
             + 2 * K * 2.0 * N * N * C_PAD)    # 2K dense operator applications
    cost = pl.CostEstimate(flops=int(flops),
                           transcendentals=int(N * C_PAD),
                           bytes_accessed=int(in_bytes + out_bytes))

    logits_pad, pred = pl.pallas_call(
        bernnet_kernel,
        out_shape=(jax.ShapeDtypeStruct((N, C_PAD), jnp.float32),
                   jax.ShapeDtypeStruct((N, 1), jnp.int32)),
        in_specs=[smem, vmem, vmem, vmem, vmem, vmem, vmem],
        out_specs=(vmem, vmem),
        scratch_shapes=[pltpu.VMEM((K + 1, N, C_PAD), jnp.float32)],
        compiler_params=pltpu.CompilerParams(vmem_limit_bytes=vmem_limit),
        cost_estimate=cost,
    )(coef, x_in, w1_t, b1_r, w2_t, b2_r, L)

    return logits_pad[:, :NUM_CLASSES], pred[:, 0]


if __name__ == "__main__":
    N_NODES = 16
    NUM_FEATURES = 16

    key = jax.random.PRNGKey(0)
    k_x, k_w1, k_b1, k_w2, k_b2 = jax.random.split(key, 5)

    # Node features.
    x = jax.random.normal(k_x, (N_NODES, NUM_FEATURES), dtype=jnp.float32)

    # Undirected ring graph (both directions listed).
    idx = jnp.arange(N_NODES, dtype=jnp.int32)
    nxt = (idx + 1) % N_NODES
    edge_index = jnp.stack([jnp.concatenate([idx, nxt]),
                            jnp.concatenate([nxt, idx])], axis=0)

    # Deterministic parameter init (shapes per the module __init__).
    w1 = 0.1 * jax.random.normal(k_w1, (HIDDEN, NUM_FEATURES), dtype=jnp.float32)
    b1 = 0.1 * jax.random.normal(k_b1, (HIDDEN,), dtype=jnp.float32)
    w2 = 0.1 * jax.random.normal(k_w2, (NUM_CLASSES, HIDDEN), dtype=jnp.float32)
    b2 = 0.1 * jax.random.normal(k_b2, (NUM_CLASSES,), dtype=jnp.float32)
    temp = jnp.ones((K + 1,), dtype=jnp.float32)  # Bern_prop.reset_parameters(): fill_(1)

    params = (w1, b1, w2, b2, temp)

    logits, prediction = bernnet_forward(x, edge_index, params)
    jax.block_until_ready((logits, prediction))

    assert logits.shape == (N_NODES, NUM_CLASSES)
    assert prediction.shape == (N_NODES,)
    # log_softmax rows must (approximately) sum to 1 in probability space.
    assert bool(jnp.all(jnp.abs(jnp.sum(jnp.exp(logits), axis=1) - 1.0) < 1e-4))
    assert bool(jnp.all((prediction >= 0) & (prediction < NUM_CLASSES)))

    print("KERNEL_OK")
</pallas_src>

<mosaic_0001>
module attributes {stable_mosaic.version = 11 : i64} {
  func.func @bernnet_kernel(%arg0: memref<11xf32, #tpu.memory_space<smem>>, %arg1: memref<16x16xbf16, #tpu.memory_space<vmem>>, %arg2: memref<16x128xbf16, #tpu.memory_space<vmem>>, %arg3: memref<1x128xf32, #tpu.memory_space<vmem>>, %arg4: memref<128x128xbf16, #tpu.memory_space<vmem>>, %arg5: memref<1x128xf32, #tpu.memory_space<vmem>>, %arg6: memref<16x16xbf16, #tpu.memory_space<vmem>>, %arg7: memref<16x128xf32, #tpu.memory_space<vmem>>, %arg8: memref<16x1xi32, #tpu.memory_space<vmem>>, %arg9: memref<11x16x128xf32, #tpu.memory_space<vmem>>) attributes {dimension_semantics = [], scalar_prefetch = 0 : i64, scratch_operands = 1 : i64, tpu.core_type = #tpu.core_type<tc>} {
    %c0 = arith.constant 0 : index
    %c0_0 = arith.constant 0 : index
    %0 = vector.load %arg1[%c0, %c0_0] : memref<16x16xbf16, #tpu.memory_space<vmem>>, vector<16x16xbf16>
    %c0_1 = arith.constant 0 : index
    %c0_2 = arith.constant 0 : index
    %1 = vector.load %arg2[%c0_1, %c0_2] : memref<16x128xbf16, #tpu.memory_space<vmem>>, vector<16x128xbf16>
    %cst = arith.constant dense<0.000000e+00> : vector<16x128xf32>
    %2 = tpu.matmul %0, %1, %cst {dimension_numbers = #tpu.dot_dimension_numbers<[1], [0], [0], [1], [0, 0, 1, 1], [], []>} : vector<16x16xbf16>, vector<16x128xbf16>, vector<16x128xf32> -> vector<16x128xf32>
    %c0_3 = arith.constant 0 : index
    %c0_4 = arith.constant 0 : index
    %3 = vector.load %arg3[%c0_3, %c0_4] : memref<1x128xf32, #tpu.memory_space<vmem>>, vector<1x128xf32>
    %4 = vector.broadcast %3 : vector<1x128xf32> to vector<16x128xf32>
    %5 = arith.addf %2, %4 : vector<16x128xf32>
    %cst_5 = arith.constant 0.000000e+00 : f32
    %6 = vector.broadcast %cst_5 : f32 to vector<16x128xf32>
    %7 = arith.maximumf %5, %6 : vector<16x128xf32>
    %8 = arith.truncf %7 : vector<16x128xf32> to vector<16x128xbf16>
    %c0_6 = arith.constant 0 : index
    %c0_7 = arith.constant 0 : index
    %9 = vector.load %arg4[%c0_6, %c0_7] : memref<128x128xbf16, #tpu.memory_space<vmem>>, vector<128x128xbf16>
    %cst_8 = arith.constant dense<0.000000e+00> : vector<16x128xf32>
    %10 = tpu.matmul %8, %9, %cst_8 {dimension_numbers = #tpu.dot_dimension_numbers<[1], [0], [0], [1], [0, 0, 1, 1], [], []>} : vector<16x128xbf16>, vector<128x128xbf16>, vector<16x128xf32> -> vector<16x128xf32>
    %c0_9 = arith.constant 0 : index
    %c0_10 = arith.constant 0 : index
    %11 = vector.load %arg5[%c0_9, %c0_10] : memref<1x128xf32, #tpu.memory_space<vmem>>, vector<1x128xf32>
    %12 = vector.broadcast %11 : vector<1x128xf32> to vector<16x128xf32>
    %13 = arith.addf %10, %12 : vector<16x128xf32>
    %c0_11 = arith.constant 0 : index
    %c0_12 = arith.constant 0 : index
    %14 = vector.load %arg6[%c0_11, %c0_12] : memref<16x16xbf16, #tpu.memory_space<vmem>>, vector<16x16xbf16>
    %c0_13 = arith.constant 0 : index
    %c0_14 = arith.constant 0 : index
    %c0_15 = arith.constant 0 : index
    %15 = vector.load %arg9[%c0_13, %c0_14, %c0_15] : memref<11x16x128xf32, #tpu.memory_space<vmem>>, vector<1x16x128xf32>
    %16 = vector.shape_cast %15 : vector<1x16x128xf32> to vector<16x128xf32>
    %17 = vector.shape_cast %13 : vector<16x128xf32> to vector<1x16x128xf32>
    tpu.vector_store %arg9[%c0_13, %c0_14, %c0_15], %17 {strides = array<i32>} : memref<11x16x128xf32, #tpu.memory_space<vmem>>, vector<1x16x128xf32>,
    %c1_i32 = arith.constant 1 : i32
    %c10_i32 = arith.constant 10 : i32
    %18 = arith.addi %c1_i32, %c10_i32 : i32
    %c1_i32_16 = arith.constant 1 : i32
    scf.for %arg10 = %c1_i32 to %18 step %c1_i32_16  : i32 {
      %c1_i32_35 = arith.constant 1 : i32
      %56 = arith.subi %arg10, %c1_i32_35 : i32
      %57 = arith.index_cast %56 : i32 to index
      %c0_36 = arith.constant 0 : index
      %c0_37 = arith.constant 0 : index
      %58 = vector.load %arg9[%57, %c0_36, %c0_37] : memref<11x16x128xf32, #tpu.memory_space<vmem>>, vector<1x16x128xf32>
      %59 = vector.shape_cast %58 : vector<1x16x128xf32> to vector<16x128xf32>
      %cst_38 = arith.constant 2.000000e+00 : f32
      %60 = vector.broadcast %cst_38 : f32 to vector<16x128xf32>
      %61 = arith.mulf %60, %59 : vector<16x128xf32>
      %62 = arith.truncf %59 : vector<16x128xf32> to vector<16x128xbf16>
      %cst_39 = arith.constant dense<0.000000e+00> : vector<16x128xf32>
      %63 = tpu.matmul %14, %62, %cst_39 {dimension_numbers = #tpu.dot_dimension_numbers<[1], [0], [0], [1], [0, 0, 1, 1], [], []>} : vector<16x16xbf16>, vector<16x128xbf16>, vector<16x128xf32> -> vector<16x128xf32>
      %64 = arith.subf %61, %63 : vector<16x128xf32>
      %65 = arith.index_cast %arg10 : i32 to index
      %c0_40 = arith.constant 0 : index
      %c0_41 = arith.constant 0 : index
      %66 = vector.load %arg9[%65, %c0_40, %c0_41] : memref<11x16x128xf32, #tpu.memory_space<vmem>>, vector<1x16x128xf32>
      %67 = vector.shape_cast %66 : vector<1x16x128xf32> to vector<16x128xf32>
      %68 = vector.shape_cast %64 : vector<16x128xf32> to vector<1x16x128xf32>
      tpu.vector_store %arg9[%65, %c0_40, %c0_41], %68 {strides = array<i32>} : memref<11x16x128xf32, #tpu.memory_space<vmem>>, vector<1x16x128xf32>,
    }
    %c10_i32_17 = arith.constant 10 : i32
    %c10 = arith.constant 10 : index
    %19 = memref.load %arg0[%c10] : memref<11xf32, #tpu.memory_space<smem>>
    %c0_18 = arith.constant 0 : index
    %c0_19 = arith.constant 0 : index
    %c0_20 = arith.constant 0 : index
    %20 = vector.load %arg9[%c0_18, %c0_19, %c0_20] : memref<11x16x128xf32, #tpu.memory_space<vmem>>, vector<1x16x128xf32>
    %21 = vector.shape_cast %20 : vector<1x16x128xf32> to vector<16x128xf32>
    %22 = vector.broadcast %19 : f32 to vector<16x128xf32>
    %23 = arith.mulf %22, %21 : vector<16x128xf32>
    %c0_i32 = arith.constant 0 : i32
    %c10_i32_21 = arith.constant 10 : i32
    %24 = arith.addi %c0_i32, %c10_i32_21 : i32
    %c1_i32_22 = arith.constant 1 : i32
    %25 = scf.for %arg10 = %c0_i32 to %24 step %c1_i32_22 iter_args(%arg11 = %23) -> (vector<16x128xf32>)  : i32 {
      %c9_i32 = arith.constant 9 : i32
      %56 = arith.subi %c9_i32, %arg10 : i32
      %57 = arith.truncf %arg11 : vector<16x128xf32> to vector<16x128xbf16>
      %cst_35 = arith.constant dense<0.000000e+00> : vector<16x128xf32>
      %58 = tpu.matmul %14, %57, %cst_35 {dimension_numbers = #tpu.dot_dimension_numbers<[1], [0], [0], [1], [0, 0, 1, 1], [], []>} : vector<16x16xbf16>, vector<16x128xbf16>, vector<16x128xf32> -> vector<16x128xf32>
      %59 = arith.index_cast %56 : i32 to index
      %60 = memref.load %arg0[%59] : memref<11xf32, #tpu.memory_space<smem>>
      %c1_i32_36 = arith.constant 1 : i32
      %61 = arith.addi %arg10, %c1_i32_36 : i32
      %62 = arith.index_cast %61 : i32 to index
      %c0_37 = arith.constant 0 : index
      %c0_38 = arith.constant 0 : index
      %63 = vector.load %arg9[%62, %c0_37, %c0_38] : memref<11x16x128xf32, #tpu.memory_space<vmem>>, vector<1x16x128xf32>
      %64 = vector.shape_cast %63 : vector<1x16x128xf32> to vector<16x128xf32>
      %65 = vector.broadcast %60 : f32 to vector<16x128xf32>
      %66 = arith.mulf %65, %64 : vector<16x128xf32>
      %67 = arith.addf %58, %66 : vector<16x128xf32>
      scf.yield %67 : vector<16x128xf32>
    }
    %c10_i32_23 = arith.constant 10 : i32
    %26 = tpu.iota {dimensions = array<i32: 1>} : vector<16x128xi32>
    %c5_i32 = arith.constant 5 : i32
    %27 = vector.broadcast %c5_i32 : i32 to vector<16x128xi32>
    %28 = arith.cmpi slt, %26, %27 : vector<16x128xi32>
    %cst_24 = arith.constant 0xFF800000 : f32
    %29 = vector.broadcast %cst_24 : f32 to vector<16x128xf32>
    %30 = arith.select %28, %25, %29 : vector<16x128xi1>, vector<16x128xf32>
    %cst_25 = arith.constant dense<0xFF800000> : vector<16xf32>
    %31 = vector.multi_reduction <maximumf>, %30, %cst_25 [1] : vector<16x128xf32> to vector<16xf32>
    %32 = vector.shape_cast %31 : vector<16xf32> to vector<16x1xf32>
    %33 = vector.broadcast %32 : vector<16x1xf32> to vector<16x128xf32>
    %34 = arith.subf %25, %33 : vector<16x128xf32>
    %35 = math.exp %34 : vector<16x128xf32>
    %cst_26 = arith.constant 0.000000e+00 : f32
    %36 = vector.broadcast %cst_26 : f32 to vector<16x128xf32>
    %37 = arith.select %28, %35, %36 : vector<16x128xi1>, vector<16x128xf32>
    %cst_27 = arith.constant dense<0.000000e+00> : vector<16xf32>
    %38 = vector.multi_reduction <add>, %37, %cst_27 [1] : vector<16x128xf32> to vector<16xf32>
    %39 = vector.shape_cast %38 : vector<16xf32> to vector<16x1xf32>
    %40 = math.log %39 : vector<16x1xf32>
    %41 = arith.addf %32, %40 : vector<16x1xf32>
    %42 = vector.broadcast %41 : vector<16x1xf32> to vector<16x128xf32>
    %43 = arith.subf %25, %42 : vector<16x128xf32>
    %cst_28 = arith.constant 0xFF800000 : f32
    %44 = vector.broadcast %cst_28 : f32 to vector<16x128xf32>
    %45 = arith.select %28, %43, %44 : vector<16x128xi1>, vector<16x128xf32>
    %c0_29 = arith.constant 0 : index
    %c0_30 = arith.constant 0 : index
    %46 = vector.load %arg7[%c0_29, %c0_30] : memref<16x128xf32, #tpu.memory_space<vmem>>, vector<16x128xf32>
    tpu.vector_store %arg7[%c0_29, %c0_30], %45 {strides = array<i32>} : memref<16x128xf32, #tpu.memory_space<vmem>>, vector<16x128xf32>,
    %cst_31 = arith.constant dense<0xFF800000> : vector<16xf32>
    %47 = vector.multi_reduction <maximumf>, %45, %cst_31 [1] : vector<16x128xf32> to vector<16xf32>
    %48 = vector.shape_cast %47 : vector<16xf32> to vector<16x1xf32>
    %49 = vector.broadcast %48 : vector<16x1xf32> to vector<16x128xf32>
    %50 = arith.cmpf oeq, %45, %49 : vector<16x128xf32>
    %c128_i32 = arith.constant 128 : i32
    %51 = vector.broadcast %c128_i32 : i32 to vector<16x128xi32>
    %52 = arith.select %50, %26, %51 : vector<16x128xi1>, vector<16x128xi32>
    %cst_32 = arith.constant dense<2147483647> : vector<16xi32>
    %53 = vector.multi_reduction <minsi>, %52, %cst_32 [1] : vector<16x128xi32> to vector<16xi32>
    %54 = vector.shape_cast %53 : vector<16xi32> to vector<16x1xi32>
    %c0_33 = arith.constant 0 : index
    %c0_34 = arith.constant 0 : index
    %55 = vector.load %arg8[%c0_33, %c0_34] : memref<16x1xi32, #tpu.memory_space<vmem>>, vector<16x1xi32>
    tpu.vector_store %arg8[%c0_33, %c0_34], %54 {strides = array<i32>} : memref<16x1xi32, #tpu.memory_space<vmem>>, vector<16x1xi32>,
    return
  }
}

</mosaic_0001>

<bundles_post_ra>
// kernel: tpu_custom_call.1
= control target key start
LH: loop header
LB: loop body
LE: loop exit
PB: predicated region body
PF: predicated region fallthrough
CT: control target
= control target key end

     0   :  { %14 = vsyncpa [#allocation6], 0  ;;  %s911_s0 = inlined_call_operand.hbm [shape: f32[11], index: 0, kind: input, shape index: {}]   ;;  %s912_s1 = inlined_call_operand.hbm [shape: bf16[16,16], index: 1, kind: input, shape index: {}]   ;;  %s913_s2 = inlined_call_operand.hbm [shape: bf16[16,128], index: 2, kind: input, shape index: {}]   ;;  %s914_s3 = inlined_call_operand.vmem [shape: f32[1,128], index: 3, kind: input, shape index: {}]   ;;  %s915_s4 = inlined_call_operand.hbm [shape: bf16[128,128], index: 4, kind: input, shape index: {}]   ;;  %s916_s5 = inlined_call_operand.vmem [shape: f32[1,128], index: 5, kind: input, shape index: {}]   ;;  %s917_s6 = inlined_call_operand.vmem [shape: bf16[16,16], index: 6, kind: input, shape index: {}]   ;;  %s918_s7 = inlined_call_operand.hbm [shape: f32[16,128], index: 7, kind: output, shape index: {0}]   ;;  %s919_s8 = inlined_call_operand.vmem [shape: s32[16,1], index: 8, kind: output, shape index: {1}]  }
   0x1   :  { %15 = vsyncpa [#allocation4], 0 }
   0x2   :  { %16 = vsyncpa [#allocation9], 0 }
   0x3   :  { %17 = vsyncpa [#allocation5], 0  ;;  %s799_s27 = smov [#allocation8]   ;;  %s800_s29 = smov [#allocation7]  }
   0x4   :  { %s43_s28 = sshll.u32 %s799_s27, 4  ;;  %s31_s30 = sshll.u32 %s800_s29, 4  ;;  %s44_s28 = int_to_ptr.vmem [resolvable:$true] %s43_s28  ;;  %s32_s30 = int_to_ptr.vmem [resolvable:$true] %s31_s30 }
   0x5   :  { %s679_s9 = scalar_lea.vmem %s44_s28, 128  ;;  %p684_p1 = scmp.lt.s32.totalorder %s44_s28, %s44_s28 }
   0x6   :  { %p680_p0 = scmp.ne.s32.totalorder %s44_s28, %s679_s9  ;;  %p685_p2 = scmp.lt.s32.totalorder %s679_s9, %s679_s9 }
   0x8   :  { %p686_p3 = por %p685_p2, %p684_p1 }
   0xa   :  { %p687_p4 = pnand %p686_p3, %p680_p0 }
   0xc   :  { %690 = shalt.err (!%p687_p4)
}
   0xd   :  { %s801_s10 = smov 64   ;;  %s802_s11 = smov 4  }
   0xe   :  { %49 = dma.hbm_to_vmem [thread:$0]  %s913_s2, 128, %s44_s28, [#allocation9], %s801_s10, %s801_s10, %s802_s11  }
   0xf   :  { %s803_s14 = smov [#allocation3]   ;;  %s707_s17 = scalar_lea.vmem %s32_s30, 128 }
  0x10   :  { %25 = dma.hbm_to_smem %s911_s0, 16, %s803_s14, [#allocation6]  }
  0x11   :  { %p708_p5 = scmp.ne.s32.totalorder %s32_s30, %s707_s17  ;;  %p712_p6 = scmp.lt.s32.totalorder %s32_s30, %s32_s30 }
  0x12   :  { %p713_p7 = scmp.lt.s32.totalorder %s707_s17, %s707_s17 }
  0x14   :  { %p714_p8 = por %p713_p7, %p712_p6 }
  0x16   :  { %p715_p9 = pnand %p714_p8, %p708_p5 }
  0x18   :  { %718 = shalt.err (!%p715_p9)
}
  0x19   :  { %37 = dma.hbm_to_vmem [thread:$0]  %s912_s1, 128, %s32_s30, [#allocation4], %s801_s10, %s801_s10, %s802_s11  }
  0x1a   :  { %s804_s20 = smov [#allocation10]  }
  0x1b   :  { %s57_s21 = sshll.u32 %s804_s20, 4  ;;  %s58_s21 = int_to_ptr.vmem [resolvable:$true] %s57_s21 }
  0x1c   :  { %s727_s2 = scalar_lea.vmem %s58_s21, 1024  ;;  %p732_p11 = scmp.lt.s32.totalorder %s58_s21, %s58_s21 }
  0x1d   :  { %p728_p10 = scmp.ne.s32.totalorder %s58_s21, %s727_s2  ;;  %p733_p12 = scmp.lt.s32.totalorder %s727_s2, %s727_s2 }
  0x1f   :  { %p734_p13 = por %p733_p12, %p732_p11 }
  0x21   :  { %p735_p0 = pnand %p734_p13, %p728_p10 }
  0x23   :  { %738 = shalt.err (!%p735_p0)
}
  0x24   :  { %63 = dma.hbm_to_vmem [thread:$0]  %s915_s4, 1024, %s58_s21, [#allocation9], %s801_s10, %s801_s10, %s802_s11  }
  0x25   :  { %775 = dma.done.wait [#allocation6], 16  }
  0x26   :  { %776 = vsyncadd [#allocation6], 4294967280 }
  0x27   :  { %777 = dma.done.wait [#allocation4], 128  }
  0x28   :  { %778 = vsyncadd [#allocation4], 4294967168 }
  0x29   :  { %779 = dma.done.wait [#allocation9], 1152  }
  0x2a   :  { %780 = vsyncadd [#allocation9], 4294966144 }
  0x2b   :  { %80 = sfence }
  0x2c   :  { %v653_v0 = vld [vmem:[#allocation8] sm:$0xff]   ;;  %v805_v1 = vmov 0.0   ;;  %v654_v2 = vld [vmem:[#allocation7] sm:$0xff]   ;;  %vm806_vm0 = vmmov 0   ;;  %vm104_vm1 = vcmask 130048   ;;  %v657_v5 = vld [vmem:[#allocation10 + $0x28] sm:$0xff]  }
  0x2d   :  { %568 = vmatprep.subr.bf16.mxu0 %v805_v1  ;;  %574 = vmatprep.subr.bf16.mxu1 %v805_v1  ;;  %v655_v3 = vld [vmem:[#allocation10 + $0x38] sm:$0xff]   ;;  %v656_v4 = vld [vmem:[#allocation10 + $0x30] sm:$0xff]   ;;  %v658_v6 = vld [vmem:[#allocation10 + $0x20] sm:$0xff]   ;;  %s884_s28 = smov 1  }
  0x2e   :  { %569 = vmatpush3.bf16.msra.mxu0 %v653_v0  ;;  %570 = vmatprep.mubr.msk.bf16.mxu0 %vm806_vm0, %v805_v1  ;;  %v659_v7 = vld [vmem:[#allocation10 + $0x18] sm:$0xff]   ;;  %v660_v8 = vld [vmem:[#allocation10 + $0x10] sm:$0xff]   ;;  %v661_v9 = vld [vmem:[#allocation10 + $0x8] sm:$0xff]  }
  0x2f   :  { %590 = vmatprep.mubr.msk.bf16.mxu1 %vm806_vm0, %v805_v1  ;;  %575 = vmatpush3.bf16.msra.mxu1 %v655_v3  ;;  %v662_v10 = vld [vmem:[#allocation10] sm:$0xff]   ;;  %v529_v11 = vld [vmem:[%s914_s3] ss:$0 sm:$0xff]  ;;  %v265_v22 = vld [vmem:[%s917_s6 + $0x4] sm:$0xf] }
  0x30   :  { %576 = vmatprep.subr.bf16.mxu1 %v805_v1  ;;  %v264_v21 = vld [vmem:[%s917_s6] sm:$0xf] }
  0x31   :  { %571 = vmatmul.mubr.msk.bf16.vlgmr.msra.gmra.mxu0 %vm104_vm1, %v654_v2  ;;  %v533_v23 = vld [vmem:[%s916_s5] ss:$0 sm:$0xff] }
  0x33   :  { %577 = vmatpush3.bf16.msra.mxu1 %v656_v4 }
  0x34   :  { %578 = vmatprep.subr.bf16.mxu1 %v805_v1 }
  0x37   :  { %579 = vmatpush3.bf16.msra.mxu1 %v657_v5 }
  0x38   :  { %580 = vmatprep.subr.bf16.mxu1 %v805_v1 }
  0x3b   :  { %581 = vmatpush3.bf16.msra.mxu1 %v658_v6 }
  0x3c   :  { %582 = vmatprep.subr.bf16.mxu1 %v805_v1 }
  0x3f   :  { %583 = vmatpush3.bf16.msra.mxu1 %v659_v7 }
  0x40   :  { %584 = vmatprep.subr.bf16.mxu1 %v805_v1 }
  0x43   :  { %585 = vmatpush3.bf16.msra.mxu1 %v660_v8 }
  0x44   :  { %586 = vmatprep.subr.bf16.mxu1 %v805_v1 }
  0x47   :  { %587 = vmatpush3.bf16.msra.mxu1 %v661_v9 }
  0x48   :  { %588 = vmatprep.subr.bf16.mxu1 %v805_v1 }
  0x4b   :  { %589 = vmatpush3.bf16.msra.mxu1 %v662_v10 }
  0xf1   :  { %v142_v12 = vpop.f32.mrf.mxu0 }
  0xf2   :  { %v143_v14 = vadd.f32 %v529_v11, %v142_v12 }
  0xf3   :  { %v572_v13 = vpop.f32.mrf.mxu0 }
  0xf4   :  { %v149_v18 = vmax.f32 %v143_v14, 0.0 }
  0xf5   :  { %v145_v15 = vpop.f32.mrf.mxu0 }
  0xf6   :  { %v146_v16 = vadd.f32 %v529_v11, %v145_v15 }
  0xf7   :  { %v573_v17 = vpop.f32.mrf.mxu0 }
  0xf8   :  { %v150_v19 = vmax.f32 %v146_v16, 0.0 }
  0xfa   :  { %v151_v20 = vpack.c.bf16 %v150_v19, %v149_v18 }
  0xfc   :  { %591 = vmatmul.mubr.bf16.vlgmr.msra.gmra.mxu1 %v151_v20 }
 0x1bc   :  { %v257_v24 = vpop.f32.mrf.mxu1 }
 0x1bd   :  { %v258_v25 = vadd.f32 %v533_v23, %v257_v24 }
 0x1be   :  { %v592_v26 = vpop.f32.mrf.mxu1 }
 0x1bf   :  { %266 = vst [vmem:[#allocation2] sm:$0xff] %v258_v25 }
 0x1c0   :  { %v260_v27 = vpop.f32.mrf.mxu1 }
 0x1c1   :  { %v261_v28 = vadd.f32 %v533_v23, %v260_v27 }
 0x1c2   :  { %v593_v29 = vpop.f32.mrf.mxu1 }
 0x1c3   :  { %267 = vst [vmem:[#allocation2 + $0x8] sm:$0xff] %v261_v28 }
 0x1c4 LB: > { %v807_v30 = vmov 0.0   ;;  %vm808_vm2 = vmmov 0   ;;  %s542_s6 = sadd.s32 4294967295, %s785_s28  ;;  %v544_v34 = vcombine.low %v264_v21, %v265_v22  ;;  %s546_s30 = sshll.u32 %s785_s28, 4  ;;  %s785_s28 = sphi %s884_s28, %s273_s28  }
 0x1c5   : > { %594 = vmatprep.subr.bf16.mxu0 %v807_v30  ;;  %596 = vmatprep.mubr.msk.bf16.mxu0 %vm808_vm2, %v807_v30  ;;  %s543_s5 = sshll.u32 %s542_s6, 4  ;;  %s334_s9 = scalar_lea.vmem [#allocation2], %s546_s30 }
 0x1c6   : > { %s276_s29 = scalar_lea.vmem [#allocation2], %s543_s5  ;;  %s273_s28 = sadd.s32 1, %s785_s28  }
 0x1c7   : > { %p270_p1 = scmp.ge.s32.totalorder %s273_s28, 11  }
 0x1c8   :  { %s547_s10 = sld [smem:[#allocation3 + $0xa]] (%p270_p1)  ;;  %s890_s11 = smov (%p270_p1), 0  }
 0x1ca   : > { %v277_v31 = vld [vmem:[%s276_s29] sm:$0xff]  ;;  %v278_v32 = vld [vmem:[%s276_s29 + $0x8] sm:$0xff] }
 0x1cb   : > { %v281_v33 = vpack.c.bf16 %v278_v32, %v277_v31  ;;  %v279_v35 = vmul.f32 2.0, %v277_v31  ;;  %v280_v38 = vmul.f32 2.0, %v278_v32 }
 0x1cd   : > { %595 = vmatpush3.bf16.msra.mxu0 %v281_v33 }
 0x1ce   :  { %v340_v45 = vstv (%p270_p1), %s547_s10 }
 0x1d0   : > { %597 = vmatmul.mubr.msk.bf16.vlgmr.msra.gmra.mxu0 %vm104_vm1, %v544_v34 }
 0x290   : > { %v324_v36 = vpop.f32.mrf.mxu0 }
 0x291   : > { %v331_v37 = vsub.f32 %v279_v35, %v324_v36 }
 0x292   : > { %v598_v39 = vpop.f32.mrf.mxu0 }
 0x293   : > { %335 = vst [vmem:[%s334_s9] sm:$0xff] %v331_v37  ;;  %272 = sbr.rel (!%p270_p1) target bundleno = 452 (0x1c4), region = 89 }
 0x294   : > { %v327_v40 = vpop.f32.mrf.mxu0 }
 0x295   : > { %v332_v41 = vsub.f32 %v280_v38, %v327_v40 }
 0x296   : > { %v599_v42 = vpop.f32.mrf.mxu0 }
 0x297   : > { %336 = vst [vmem:[%s334_s9 + $0x8] sm:$0xff] %v332_v41 }
 0x29e   :  { %v338_v43 = vld [vmem:[#allocation2] sm:$0xff]  ;;  %v339_v44 = vld [vmem:[#allocation2 + $0x8] sm:$0xff] }
 0x29f   :  { %v341_v46 = vmul.f32 %v340_v45, %v338_v43   ;;  %v342_v47 = vmul.f32 %v340_v45, %v339_v44  }
 0x2a1   :  { %v787_v48 = vmov %v342_v47   ;;  %v791_v49 = vmov %v341_v46  }
 0x2a2 LB: > { %v809_v50 = vmov 0.0   ;;  %vm810_vm3 = vmmov 0   ;;  %v352_v51 = vpack.c.bf16 %v789_v48, %v793_v49  ;;  %s351_s12 = ssub.s32 9, %s797_s11  ;;  %s548_s14 = sshll.u32 %s797_s11, 4  ;;  %s797_s11 = sphi %s890_s11, %s348_s11   ;;  %v793_v49 = vphi %v791_v49, %v792_v49   ;;  %v789_v48 = vphi %v787_v48, %v788_v48  }
 0x2a3   : > { %600 = vmatprep.subr.bf16.mxu0 %v809_v50  ;;  %602 = vmatprep.mubr.msk.bf16.mxu0 %vm810_vm3, %v809_v50  ;;  %s353_s13 = sld [smem:[#allocation3 + %s351_s12]]  ;;  %s511_s15 = scalar_lea.vmem [#allocation2], %s548_s14 }
 0x2a4   : > { %601 = vmatpush3.bf16.msra.mxu0 %v352_v51  ;;  %v549_v52 = vld [vmem:[%s511_s15 + $0x10] sm:$0xff]  ;;  %v550_v55 = vld [vmem:[%s511_s15 + $0x18] sm:$0xff]  ;;  %s348_s11 = sadd.s32 1, %s797_s11  }
 0x2a5   : > { %p345_p2 = scmp.ge.s32.totalorder %s348_s11, 10  }
 0x2a6   :  { %v411_v63 = vlaneseq (%p345_p2)  ;;  %s811_s16 = smov (%p345_p2), [#allocation11]  }
 0x2a7   : > { %603 = vmatmul.mubr.msk.bf16.vlgmr.msra.gmra.mxu0 %vm104_vm1, %v544_v34  ;;  %s488_s17 = sshll.u32 (%p345_p2), %s811_s16, 4  ;;  %s489_s17 = int_to_ptr.vmem [resolvable:$true] %s488_s17 }
 0x2a8   :  { %v412_v0 = vand.u32 (%p345_p2), 127, %v411_v63  ;;  %s739_s18 = scalar_lea.vmem (%p345_p2), %s489_s17, 256  ;;  %p744_p4 = scmp.lt.s32.totalorder (%p345_p2), %s489_s17, %s489_s17 }
 0x2a9   : > { %v359_v53 = vstv %s353_s13  ;;  %p740_p3 = scmp.ne.s32.totalorder (%p345_p2), %s489_s17, %s739_s18  ;;  %p745_p5 = scmp.lt.s32.totalorder (%p345_p2), %s739_s18, %s739_s18 }
 0x2aa   : > { %v360_v54 = vmul.f32 %v549_v52, %v359_v53  ;;  %v361_v58 = vmul.f32 %v550_v55, %v359_v53  ;;  %vm413_vm4 = vcmp.lt.s32.totalorder (%p345_p2), %v412_v0, 5 }
 0x2ab   :  { %p746_p6 = por (%p345_p2), %p745_p5, %p744_p4 }
 0x2ad   :  { %p747_p7 = pnand (%p345_p2), %p746_p6, %p740_p3 }
 0x367   : > { %v404_v56 = vpop.f32.mrf.mxu0 }
 0x368   : > { %v405_v57 = vadd.f32 %v404_v56, %v360_v54  }
 0x369   : > { %v604_v59 = vpop.f32.mrf.mxu0 }
 0x36a   : > { %v792_v49 = vmov %v405_v57   ;;  %347 = sbr.rel (!%p345_p2) target bundleno = 674 (0x2a2), region = 100  ;;  %v414_v1 = vsel (%p345_p2), %vm413_vm4, %v405_v57, -inf }
 0x36b   : > { %v407_v60 = vpop.f32.mrf.mxu0  ;;  %416 = vmax.xlane.f32.xlu0 (%p345_p2), %v414_v1 }
 0x36c   : > { %v408_v61 = vadd.f32 %v407_v60, %v361_v58  }
 0x36d   : > { %v605_v62 = vpop.f32.mrf.mxu0 }
 0x36e   : > { %v788_v48 = vmov %v408_v61   ;;  %v415_v2 = vsel (%p345_p2), %vm413_vm4, %v408_v61, -inf }
 0x36f   :  { %418 = vmax.xlane.f32.xlu0 %v415_v2 }
 0x3f4   :  { %v417_v3 = vpop.xlane.xlu0 %416 }
 0x3f5   :  { %v420_v4 = vsub.f32 %v405_v57, %v417_v3 }
 0x3f7   :  { %v422_v5 = vmul.f32 1.442695, %v420_v4 }
 0x3f8   :  { %v419_v6 = vpop.xlane.xlu0 %418 }
 0x3f9   :  { %663 = vpow2.f32 %v422_v5  ;;  %v421_v7 = vsub.f32 %v408_v61, %v419_v6 }
 0x3fb   :  { %v424_v8 = vmul.f32 1.442695, %v421_v7 }
 0x3fd   :  { %665 = vpow2.f32 %v424_v8 }
 0x406   :  { %v664_v9 = vpop.eup %663 }
 0x407   :  { %v426_v10 = vsel %vm413_vm4, %v664_v9, 0.0 }
 0x408   :  { %428 = vadd.xlane.f32.xlu1 %v426_v10 }
 0x40a   :  { %v666_v11 = vpop.eup %665 }
 0x40b   :  { %v427_v12 = vsel %vm413_vm4, %v666_v11, 0.0 }
 0x40c   :  { %430 = vadd.xlane.f32.xlu1 %v427_v12 }
 0x491   :  { %v429_v13 = vpop.xlane.xlu1 %428 }
 0x492   :  { %667 = vlog2.f32 %v429_v13 }
 0x495   :  { %v431_v14 = vpop.xlane.xlu1 %430 }
 0x496   :  { %669 = vlog2.f32 %v431_v14 }
 0x49f   :  { %v668_v15 = vpop.eup %667 }
 0x4a0   :  { %v433_v16 = vmul.f32 0.6931472, %v668_v15 }
 0x4a2   :  { %v436_v17 = vadd.f32 %v433_v16, %v417_v3 }
 0x4a3   :  { %v670_v18 = vpop.eup %669 }
 0x4a4   :  { %v435_v19 = vmul.f32 0.6931472, %v670_v18  ;;  %v438_v20 = vsub.f32 %v405_v57, %v436_v17 }
 0x4a6   :  { %v440_v21 = vsel %vm413_vm4, %v438_v20, -inf  ;;  %v437_v22 = vadd.f32 %v435_v19, %v419_v6 }
 0x4a7   :  { %444 = vmax.xlane.f32.xlu0 %v440_v21  ;;  %442 = vst [vmem:[#allocation11] sm:$0xff] %v440_v21 }
 0x4a8   :  { %v439_v23 = vsub.f32 %v408_v61, %v437_v22 }
 0x4aa   :  { %v441_v24 = vsel %vm413_vm4, %v439_v23, -inf }
 0x4ab   :  { %446 = vmax.xlane.f32.xlu1 %v441_v24  ;;  %443 = vst [vmem:[#allocation11 + $0x8] sm:$0xff] %v441_v24 }
 0x530   :  { %v445_v25 = vpop.xlane.xlu0 %444 }
 0x531   :  { %vm448_vm5 = vcmp.eq.f32.partialorder %v440_v21, %v445_v25 }
 0x532   :  { %v450_v26 = vsel %vm448_vm5, %v412_v0, 128 }
 0x533   :  { %v453_v27 = vshra.s32 %v450_v26, 16  ;;  %v452_v33 = vand.u32 65535, %v450_v26 }
 0x534   :  { %v447_v28 = vpop.xlane.xlu1 %446 }
 0x535   :  { %vm449_vm6 = vcmp.eq.f32.partialorder %v441_v24, %v447_v28  ;;  %v455_v29 = vcvt.s32.f32 %v453_v27  ;;  %v454_v36 = vcvt.s32.f32 %v452_v33 }
 0x536   :  { %v451_v30 = vsel %vm449_vm6, %v412_v0, 128 }
 0x537   :  { %456 = vmin.xlane.f32.xlu0 %v455_v29  ;;  %v467_v31 = vshra.s32 %v451_v30, 16  ;;  %v466_v34 = vand.u32 65535, %v451_v30 }
 0x539   :  { %v469_v32 = vcvt.s32.f32 %v467_v31  ;;  %v468_v39 = vcvt.s32.f32 %v466_v34 }
 0x53b   :  { %470 = vmin.xlane.f32.xlu1 %v469_v32 }
 0x5c0   :  { %v457_v35 = vpop.xlane.xlu0 %456 }
 0x5c1   :  { %vm458_vm7 = vcmp.eq.f32.partialorder %v455_v29, %v457_v35 }
 0x5c2   :  { %v459_v37 = vsel %vm458_vm7, %v454_v36, inf }
 0x5c3   :  { %460 = vmin.xlane.f32.xlu0 %v459_v37 }
 0x5c4   :  { %v471_v38 = vpop.xlane.xlu1 %470 }
 0x5c5   :  { %vm472_vm8 = vcmp.eq.f32.partialorder %v469_v32, %v471_v38 }
 0x5c6   :  { %v473_v40 = vsel %vm472_vm8, %v468_v39, inf }
 0x5c7   :  { %474 = vmin.xlane.f32.xlu1 %v473_v40 }
 0x5c8   :  { %750 = shalt.err (!%p747_p7)
}
 0x5c9   :  { %s812_s19 = smov 128   ;;  %s813_s20 = smov 8   ;;  %v463_v41 = vcvt.f32.s32 %v457_v35  ;;  %v477_v44 = vcvt.f32.s32 %v471_v38  ;;  %vm480_vm9 = vcmask 7168  }
 0x5ca   :  { %494 = dma.vmem_to_hbm [thread:$0]  %s489_s17, 256, %s918_s7, [#allocation5], %s812_s19, %s812_s19, %s813_s20  }
 0x5cb   :  { %v464_v43 = vshll.u32 %v463_v41, 16  ;;  %v478_v48 = vshll.u32 %v477_v44, 16 }
 0x64c   :  { %v461_v42 = vpop.xlane.xlu0 %460 }
 0x64d   :  { %v462_v45 = vcvt.f32.s32 %v461_v42 }
 0x64f   :  { %v465_v46 = vadd.s32 %v464_v43, %v462_v45 }
 0x650   :  { %v475_v47 = vpop.xlane.xlu1 %474 }
 0x651   :  { %481 = vst.msk [vmem:[%s919_s8] sm:$0xff] %vm480_vm9, %v465_v46  ;;  %v476_v49 = vcvt.f32.s32 %v475_v47 }
 0x653   :  { %v479_v50 = vadd.s32 %v478_v48, %v476_v49 }
 0x655   :  { %482 = vst.msk [vmem:[%s919_s8 + $0x8] sm:$0xff] %vm480_vm9, %v479_v50 }
 0x656   :  { %781 = dma.done.wait [#allocation5], 256  }
 0x657   :  { %782 = vsyncadd [#allocation5], 4294967040 }
 0x658   :  { %502 = vsyncpa [#allocation4], 1 }
 0x659   :  { %503 = vsyncpa [#allocation9], 1 }
 0x65a   :  { %504 = vsyncpa [#allocation5], 1 }
 0x65b   :  { %505 = vsyncpa [#allocation6], 1 }

</bundles_post_ra>
